<compile_context>
chip_gen: v7x
topology: tpu7x:2x2x1
jax: 0.10.0
libtpu: 0.0.40
codegen_flags: <defaults>
</compile_context>

<pallas_src>
import functools
import math

import jax
import jax.numpy as jnp
from jax.experimental import pallas as pl
from jax.experimental.pallas import tpu as pltpu

_LANES = 128


def lstm_mlp_kernel(x_ref, wih0p_ref, ball_ref, wwave_ref,
                    fc1w_ref, fc1b_ref, fc2w_ref, fc2b_ref,
                    out_ref, xg_ref, *, Bp, T, H):
    """Whole forward pass in VMEM: wavefronted 2-layer LSTM + FC head.

    x_ref:     ((T+1)*Bp, D) bf16, t-major rows (row = t*Bp + b); last time
               block is all-zero (bias-only row block for the final wave).
    wih0p_ref: (D, 8H) bf16  — Wih0 columns in interleaved gate-major layout,
               layer-1 column blocks zero.
    ball_ref:  (1, 8H) f32   — (b_ih+b_hh) of layer 0 / layer 1, interleaved.
    wwave_ref: (2H, 8H) bf16 — fused recurrent weights [[Whh0,Wih1],[0,Whh1]],
               columns interleaved [i0,i1,f0,f1,g0,g1,o0,o1].
    fc1w_ref:  (H, H//2) bf16   fc1b_ref: (1, H//2) f32
    fc2w_ref:  (1, H//2) f32    fc2b_ref: (1, 1) f32
    out_ref:   (Bp, 128) f32 lane-dense output tile; column 0 holds the result.
    xg_ref:    ((T+1)*Bp, 8H) f32 VMEM scratch for the hoisted input projection.
    """
    TH = 2 * H          # combined (layer-0 | layer-1) state width
    G2 = 8 * H          # fused gate width

    w_wave = wwave_ref[...]                       # keep resident across the loop

    # ---- Hoisted layer-0 input projection over ALL timesteps (one GEMM) ----
    # TODO(synk): with D=4 this K=4 GEMM wastes the MXU; a 4x broadcast-FMA VPU
    # formulation would shave its push/pop latency off the head of the chain.
    xg_ref[...] = (jnp.dot(x_ref[...], wih0p_ref[...],
                           preferred_element_type=jnp.float32)
                   + ball_ref[...])               # ((T+1)*Bp, 8H) f32

    # 1.0 on layer-0 lanes (0..H-1) of the 2H-wide state, 0.0 on layer-1 lanes.
    layer0_mask = (jax.lax.broadcasted_iota(jnp.int32, (Bp, TH), 1) < H
                   ).astype(jnp.float32)

    def gate_split(pre):
        # Two full-width EUP passes; gate extraction is cheap lane slicing.
        s = jax.nn.sigmoid(pre)                   # (Bp, 8H)
        t = jnp.tanh(pre)                         # (Bp, 8H)
        return (s[:, 0 * TH:1 * TH],              # i  (both layers)
                s[:, 1 * TH:2 * TH],              # f
                t[:, 2 * TH:3 * TH],              # g
                s[:, 3 * TH:4 * TH])              # o

    # ---- Wave 0: layer-0 step 0 only (h = c = 0 -> recurrent matmul skipped).
    # The layer-1 half of the cell state is masked back to its zero initial
    # value; its hidden half is then o * tanh(0) = 0 automatically.
    i_b, f_b, g_b, o_b = gate_split(xg_ref[pl.ds(0, Bp), :])
    c_both = (i_b * g_b) * layer0_mask            # (Bp, 2H) f32
    h_both = o_b * jnp.tanh(c_both)               # (Bp, 2H) f32

    # ---- Waves 1..T: layer-0 step w and layer-1 step w-1, ONE fused matmul
    # per wave ((Bp, 2H) x (2H, 8H), N = 256). Fully unrolled (static T). ----
    for w in range(1, T + 1):
        pre = xg_ref[pl.ds(w * Bp, Bp), :] + jnp.dot(
            h_both.astype(jnp.bfloat16), w_wave,
            preferred_element_type=jnp.float32)   # (Bp, 8H) f32
        i_b, f_b, g_b, o_b = gate_split(pre)
        c_both = f_b * c_both + i_b * g_b
        h_both = o_b * jnp.tanh(c_both)
    # At w == T the layer-0 half of the update is a spurious "step T" driven
    # only by biases; nothing downstream reads it.

    # last_output = lstm_out[:, -1, :] == layer-1 hidden after step T-1.
    # TODO(synk): nn.Dropout is identity in eval mode; no stochastic dropout.
    h1 = h_both[:, H:TH]                          # (Bp, H) f32

    # ---- FC head: Linear(H, H//2) -> ReLU -> Linear(H//2, 1) ----------------
    z = jnp.maximum(
        jnp.dot(h1.astype(jnp.bfloat16), fc1w_ref[...],
                preferred_element_type=jnp.float32) + fc1b_ref[...],
        0.0)                                      # (Bp, H//2)
    # fc2 has N=1: VPU multiply + lane reduction instead of a 1-column matmul.
    y = jnp.sum(z * fc2w_ref[...], axis=-1, keepdims=True) + fc2b_ref[...]
    # Lane-dense, full-sublane (Bp=8) store -> unmasked vst.
    out_ref[...] = jnp.broadcast_to(y, out_ref.shape)


def init_params(key, input_size, hidden_dim):
    """Deterministic parameter init matching PyTorch nn.LSTM / nn.Linear shapes."""
    H = hidden_dim
    ks = jax.random.split(key, 12)
    s = 1.0 / jnp.sqrt(jnp.float32(H))

    def u(k, shape):
        return jax.random.uniform(k, shape, jnp.float32, -s, s)

    return dict(
        w_ih_l0=u(ks[0], (4 * H, input_size)),
        w_hh_l0=u(ks[1], (4 * H, H)),
        b_ih_l0=u(ks[2], (4 * H,)),
        b_hh_l0=u(ks[3], (4 * H,)),
        w_ih_l1=u(ks[4], (4 * H, H)),
        w_hh_l1=u(ks[5], (4 * H, H)),
        b_ih_l1=u(ks[6], (4 * H,)),
        b_hh_l1=u(ks[7], (4 * H,)),
        fc1_w=u(ks[8], (H // 2, H)),
        fc1_b=u(ks[9], (H // 2,)),
        fc2_w=u(ks[10], (1, H // 2)),
        fc2_b=u(ks[11], (1,)),
    )


def pack_params(params, hidden_dim):
    """One-time repack of PyTorch-layout params into the fused kernel layout."""
    H = hidden_dim
    t = lambda w: jnp.asarray(w).T                       # (out,in) -> (in,out)

    wih0 = t(params["w_ih_l0"])                          # (D, 4H) cols [i|f|g|o]
    whh0 = t(params["w_hh_l0"])                          # (H, 4H)
    wih1 = t(params["w_ih_l1"])                          # (H, 4H)
    whh1 = t(params["w_hh_l1"])                          # (H, 4H)
    b0 = (params["b_ih_l0"] + params["b_hh_l0"])[None, :]   # (1, 4H)
    b1 = (params["b_ih_l1"] + params["b_hh_l1"])[None, :]   # (1, 4H)

    def interleave(a, b):
        # (...,4H) x (...,4H) -> (...,8H) with blocks [i0,i1,f0,f1,g0,g1,o0,o1]
        blocks = []
        for g in range(4):
            blocks.append(a[..., g * H:(g + 1) * H])
            blocks.append(b[..., g * H:(g + 1) * H])
        return jnp.concatenate(blocks, axis=-1)

    # Fused recurrent weight: rows 0..H-1 multiply h0, rows H..2H-1 multiply h1.
    w_wave = jnp.concatenate(
        [interleave(whh0, wih1),                          # h0 -> [Whh0 | Wih1]
         interleave(jnp.zeros_like(whh1), whh1)],         # h1 -> [  0  | Whh1]
        axis=0).astype(jnp.bfloat16)                      # (2H, 8H)

    wih0p = interleave(wih0, jnp.zeros_like(wih0)).astype(jnp.bfloat16)  # (D, 8H)
    b_all = interleave(b0, b1).astype(jnp.float32)                       # (1, 8H)

    return dict(
        wih0p=wih0p, b_all=b_all, w_wave=w_wave,
        fc1w=t(params["fc1_w"]).astype(jnp.bfloat16),     # (H, H//2)
        fc1b=params["fc1_b"][None, :].astype(jnp.float32),
        fc2w=params["fc2_w"].astype(jnp.float32),         # (1, H//2) row (VPU reduce)
        fc2b=params["fc2_b"][None, :].astype(jnp.float32),
    )


def lstm_model_forward(packed, x):
    """Pallas implementation of LSTMModel.forward (eval mode).  x: (B, T, D)."""
    B, T, D = x.shape
    H = packed["fc1w"].shape[0]
    Bp = max(8, ((B + 7) // 8) * 8)   # pad batch to the f32 sublane tile

    # Batch-pad + one extra zero ("bias-only") timestep, then t-major flatten.
    # x is tiny (a few hundred bytes) so this wrapper-side relayout is free.
    xp = jnp.pad(x.astype(jnp.bfloat16), ((0, Bp - B), (0, 1), (0, 0)))  # (Bp,T+1,D)
    x_flat = jnp.transpose(xp, (1, 0, 2)).reshape((T + 1) * Bp, D)

    args = (
        x_flat,
        packed["wih0p"], packed["b_all"], packed["w_wave"],
        packed["fc1w"], packed["fc1b"], packed["fc2w"], packed["fc2b"],
    )

    out_shape = jax.ShapeDtypeStruct((Bp, _LANES), jnp.float32)
    resident = sum(math.prod(a.shape) * a.dtype.itemsize for a in args)
    resident += math.prod(out_shape.shape) * 4
    resident += (T + 1) * Bp * 8 * H * 4          # xg scratch
    vmem_limit = int(min(64 * 1024 * 1024, max(8 * 1024 * 1024, 4 * resident)))

    out = pl.pallas_call(
        functools.partial(lstm_mlp_kernel, Bp=Bp, T=T, H=H),
        out_shape=out_shape,
        in_specs=[pl.BlockSpec(memory_space=pltpu.MemorySpace.VMEM)] * len(args),
        out_specs=pl.BlockSpec(memory_space=pltpu.MemorySpace.VMEM),
        scratch_shapes=[pltpu.VMEM(((T + 1) * Bp, 8 * H), jnp.float32)],
        compiler_params=pltpu.CompilerParams(vmem_limit_bytes=vmem_limit),
    )(*args)
    return out[:B, 0]                             # lane-dense (Bp, 128) -> (B,)


def lstm_model_reference(params, x):
    """Pure-JAX f32 reference of the same forward pass, for verification."""
    B, T, D = x.shape
    H = params["w_hh_l0"].shape[1]

    def cell(x_t, h, c, w_ih, w_hh, b):
        pre = x_t @ w_ih.T + h @ w_hh.T + b
        i = jax.nn.sigmoid(pre[:, 0 * H:1 * H])
        f = jax.nn.sigmoid(pre[:, 1 * H:2 * H])
        g = jnp.tanh(pre[:, 2 * H:3 * H])
        o = jax.nn.sigmoid(pre[:, 3 * H:4 * H])
        c_new = f * c + i * g
        h_new = o * jnp.tanh(c_new)
        return h_new, c_new

    b0 = params["b_ih_l0"] + params["b_hh_l0"]
    b1 = params["b_ih_l1"] + params["b_hh_l1"]
    h0 = c0 = h1 = c1 = jnp.zeros((B, H), jnp.float32)
    for t in range(T):
        h0, c0 = cell(x[:, t, :], h0, c0, params["w_ih_l0"], params["w_hh_l0"], b0)
        h1, c1 = cell(h0, h1, c1, params["w_ih_l1"], params["w_hh_l1"], b1)

    z = jnp.maximum(h1 @ params["fc1_w"].T + params["fc1_b"], 0.0)
    return (z @ params["fc2_w"].T + params["fc2_b"])[:, 0]


if __name__ == "__main__":
    B, T, D, H = 2, 8, 4, 32

    key = jax.random.PRNGKey(0)
    k_params, k_x = jax.random.split(key)
    params = init_params(k_params, input_size=D, hidden_dim=H)
    packed = pack_params(params, hidden_dim=H)
    x = jax.random.normal(k_x, (B, T, D), jnp.float32)

    out = jax.block_until_ready(lstm_model_forward(packed, x))
    ref = jax.block_until_ready(lstm_model_reference(params, x))

    assert out.shape == (B,), f"unexpected output shape {out.shape}"
    # bf16 MXU operands (f32 accumulation/state) -> slightly looser tolerance
    # than the pure-f32 reference.
    assert jnp.allclose(out, ref, rtol=5e-2, atol=5e-2), (out, ref)
    print("KERNEL_OK")
</pallas_src>

<mosaic_0001>
module attributes {stable_mosaic.version = 11 : i64} {
  func.func @lstm_mlp_kernel(%arg0: memref<72x4xbf16, #tpu.memory_space<vmem>>, %arg1: memref<4x256xbf16, #tpu.memory_space<vmem>>, %arg2: memref<1x256xf32, #tpu.memory_space<vmem>>, %arg3: memref<64x256xbf16, #tpu.memory_space<vmem>>, %arg4: memref<32x16xbf16, #tpu.memory_space<vmem>>, %arg5: memref<1x16xf32, #tpu.memory_space<vmem>>, %arg6: memref<1x16xf32, #tpu.memory_space<vmem>>, %arg7: memref<1x1xf32, #tpu.memory_space<vmem>>, %arg8: memref<8x128xf32, #tpu.memory_space<vmem>>, %arg9: memref<72x256xf32, #tpu.memory_space<vmem>>) attributes {dimension_semantics = [], scalar_prefetch = 0 : i64, scratch_operands = 1 : i64, tpu.core_type = #tpu.core_type<tc>} {
    %c0 = arith.constant 0 : index
    %c0_0 = arith.constant 0 : index
    %0 = vector.load %arg3[%c0, %c0_0] : memref<64x256xbf16, #tpu.memory_space<vmem>>, vector<64x256xbf16>
    %c0_1 = arith.constant 0 : index
    %c0_2 = arith.constant 0 : index
    %1 = vector.load %arg0[%c0_1, %c0_2] : memref<72x4xbf16, #tpu.memory_space<vmem>>, vector<72x4xbf16>
    %c0_3 = arith.constant 0 : index
    %c0_4 = arith.constant 0 : index
    %2 = vector.load %arg1[%c0_3, %c0_4] : memref<4x256xbf16, #tpu.memory_space<vmem>>, vector<4x256xbf16>
    %cst = arith.constant dense<0.000000e+00> : vector<72x256xf32>
    %3 = tpu.matmul %1, %2, %cst {dimension_numbers = #tpu.dot_dimension_numbers<[1], [0], [0], [1], [0, 0, 1, 1], [], []>} : vector<72x4xbf16>, vector<4x256xbf16>, vector<72x256xf32> -> vector<72x256xf32>
    %c0_5 = arith.constant 0 : index
    %c0_6 = arith.constant 0 : index
    %4 = vector.load %arg2[%c0_5, %c0_6] : memref<1x256xf32, #tpu.memory_space<vmem>>, vector<1x256xf32>
    %5 = vector.broadcast %4 : vector<1x256xf32> to vector<72x256xf32>
    %6 = arith.addf %3, %5 : vector<72x256xf32>
    %c0_7 = arith.constant 0 : index
    %c0_8 = arith.constant 0 : index
    %7 = vector.load %arg9[%c0_7, %c0_8] : memref<72x256xf32, #tpu.memory_space<vmem>>, vector<72x256xf32>
    tpu.vector_store %arg9[%c0_7, %c0_8], %6 {strides = array<i32>} : memref<72x256xf32, #tpu.memory_space<vmem>>, vector<72x256xf32>,
    %8 = tpu.iota {dimensions = array<i32: 1>} : vector<8x64xi32>
    %c32_i32 = arith.constant 32 : i32
    %9 = vector.broadcast %c32_i32 : i32 to vector<8x64xi32>
    %10 = arith.cmpi slt, %8, %9 : vector<8x64xi32>
    %11 = arith.extui %10 : vector<8x64xi1> to vector<8x64xi32>
    %12 = arith.sitofp %11 : vector<8x64xi32> to vector<8x64xf32>
    %c0_9 = arith.constant 0 : index
    %c0_10 = arith.constant 0 : index
    %13 = vector.load %arg9[%c0_9, %c0_10] : memref<72x256xf32, #tpu.memory_space<vmem>>, vector<8x256xf32>
    %14 = arith.negf %13 : vector<8x256xf32>
    %15 = math.exp %14 : vector<8x256xf32>
    %cst_11 = arith.constant 1.000000e+00 : f32
    %16 = vector.broadcast %cst_11 : f32 to vector<8x256xf32>
    %17 = arith.addf %16, %15 : vector<8x256xf32>
    %18 = arith.divf %16, %17 : vector<8x256xf32>
    %19 = math.tanh %13 : vector<8x256xf32>
    %20 = vector.extract_strided_slice %18 {offsets = [0, 0], sizes = [8, 64], strides = [1, 1]} : vector<8x256xf32> to vector<8x64xf32>
    %21 = vector.extract_strided_slice %19 {offsets = [0, 128], sizes = [8, 64], strides = [1, 1]} : vector<8x256xf32> to vector<8x64xf32>
    %22 = vector.extract_strided_slice %18 {offsets = [0, 192], sizes = [8, 64], strides = [1, 1]} : vector<8x256xf32> to vector<8x64xf32>
    %23 = arith.mulf %20, %21 : vector<8x64xf32>
    %24 = arith.mulf %23, %12 : vector<8x64xf32>
    %25 = math.tanh %24 : vector<8x64xf32>
    %26 = arith.mulf %22, %25 : vector<8x64xf32>
    %c8 = arith.constant 8 : index
    %c0_12 = arith.constant 0 : index
    %27 = vector.load %arg9[%c8, %c0_12] : memref<72x256xf32, #tpu.memory_space<vmem>>, vector<8x256xf32>
    %28 = arith.truncf %26 : vector<8x64xf32> to vector<8x64xbf16>
    %cst_13 = arith.constant dense<0.000000e+00> : vector<8x256xf32>
    %29 = tpu.matmul %28, %0, %cst_13 {dimension_numbers = #tpu.dot_dimension_numbers<[1], [0], [0], [1], [0, 0, 1, 1], [], []>} : vector<8x64xbf16>, vector<64x256xbf16>, vector<8x256xf32> -> vector<8x256xf32>
    %30 = arith.addf %27, %29 : vector<8x256xf32>
    %31 = arith.negf %30 : vector<8x256xf32>
    %32 = math.exp %31 : vector<8x256xf32>
    %cst_14 = arith.constant 1.000000e+00 : f32
    %33 = vector.broadcast %cst_14 : f32 to vector<8x256xf32>
    %34 = arith.addf %33, %32 : vector<8x256xf32>
    %35 = arith.divf %33, %34 : vector<8x256xf32>
    %36 = math.tanh %30 : vector<8x256xf32>
    %37 = vector.extract_strided_slice %35 {offsets = [0, 0], sizes = [8, 64], strides = [1, 1]} : vector<8x256xf32> to vector<8x64xf32>
    %38 = vector.extract_strided_slice %35 {offsets = [0, 64], sizes = [8, 64], strides = [1, 1]} : vector<8x256xf32> to vector<8x64xf32>
    %39 = vector.extract_strided_slice %36 {offsets = [0, 128], sizes = [8, 64], strides = [1, 1]} : vector<8x256xf32> to vector<8x64xf32>
    %40 = vector.extract_strided_slice %35 {offsets = [0, 192], sizes = [8, 64], strides = [1, 1]} : vector<8x256xf32> to vector<8x64xf32>
    %41 = arith.mulf %38, %24 : vector<8x64xf32>
    %42 = arith.mulf %37, %39 : vector<8x64xf32>
    %43 = arith.addf %41, %42 : vector<8x64xf32>
    %44 = math.tanh %43 : vector<8x64xf32>
    %45 = arith.mulf %40, %44 : vector<8x64xf32>
    %c16 = arith.constant 16 : index
    %c0_15 = arith.constant 0 : index
    %46 = vector.load %arg9[%c16, %c0_15] : memref<72x256xf32, #tpu.memory_space<vmem>>, vector<8x256xf32>
    %47 = arith.truncf %45 : vector<8x64xf32> to vector<8x64xbf16>
    %cst_16 = arith.constant dense<0.000000e+00> : vector<8x256xf32>
    %48 = tpu.matmul %47, %0, %cst_16 {dimension_numbers = #tpu.dot_dimension_numbers<[1], [0], [0], [1], [0, 0, 1, 1], [], []>} : vector<8x64xbf16>, vector<64x256xbf16>, vector<8x256xf32> -> vector<8x256xf32>
    %49 = arith.addf %46, %48 : vector<8x256xf32>
    %50 = arith.negf %49 : vector<8x256xf32>
    %51 = math.exp %50 : vector<8x256xf32>
    %cst_17 = arith.constant 1.000000e+00 : f32
    %52 = vector.broadcast %cst_17 : f32 to vector<8x256xf32>
    %53 = arith.addf %52, %51 : vector<8x256xf32>
    %54 = arith.divf %52, %53 : vector<8x256xf32>
    %55 = math.tanh %49 : vector<8x256xf32>
    %56 = vector.extract_strided_slice %54 {offsets = [0, 0], sizes = [8, 64], strides = [1, 1]} : vector<8x256xf32> to vector<8x64xf32>
    %57 = vector.extract_strided_slice %54 {offsets = [0, 64], sizes = [8, 64], strides = [1, 1]} : vector<8x256xf32> to vector<8x64xf32>
    %58 = vector.extract_strided_slice %55 {offsets = [0, 128], sizes = [8, 64], strides = [1, 1]} : vector<8x256xf32> to vector<8x64xf32>
    %59 = vector.extract_strided_slice %54 {offsets = [0, 192], sizes = [8, 64], strides = [1, 1]} : vector<8x256xf32> to vector<8x64xf32>
    %60 = arith.mulf %57, %43 : vector<8x64xf32>
    %61 = arith.mulf %56, %58 : vector<8x64xf32>
    %62 = arith.addf %60, %61 : vector<8x64xf32>
    %63 = math.tanh %62 : vector<8x64xf32>
    %64 = arith.mulf %59, %63 : vector<8x64xf32>
    %c24 = arith.constant 24 : index
    %c0_18 = arith.constant 0 : index
    %65 = vector.load %arg9[%c24, %c0_18] : memref<72x256xf32, #tpu.memory_space<vmem>>, vector<8x256xf32>
    %66 = arith.truncf %64 : vector<8x64xf32> to vector<8x64xbf16>
    %cst_19 = arith.constant dense<0.000000e+00> : vector<8x256xf32>
    %67 = tpu.matmul %66, %0, %cst_19 {dimension_numbers = #tpu.dot_dimension_numbers<[1], [0], [0], [1], [0, 0, 1, 1], [], []>} : vector<8x64xbf16>, vector<64x256xbf16>, vector<8x256xf32> -> vector<8x256xf32>
    %68 = arith.addf %65, %67 : vector<8x256xf32>
    %69 = arith.negf %68 : vector<8x256xf32>
    %70 = math.exp %69 : vector<8x256xf32>
    %cst_20 = arith.constant 1.000000e+00 : f32
    %71 = vector.broadcast %cst_20 : f32 to vector<8x256xf32>
    %72 = arith.addf %71, %70 : vector<8x256xf32>
    %73 = arith.divf %71, %72 : vector<8x256xf32>
    %74 = math.tanh %68 : vector<8x256xf32>
    %75 = vector.extract_strided_slice %73 {offsets = [0, 0], sizes = [8, 64], strides = [1, 1]} : vector<8x256xf32> to vector<8x64xf32>
    %76 = vector.extract_strided_slice %73 {offsets = [0, 64], sizes = [8, 64], strides = [1, 1]} : vector<8x256xf32> to vector<8x64xf32>
    %77 = vector.extract_strided_slice %74 {offsets = [0, 128], sizes = [8, 64], strides = [1, 1]} : vector<8x256xf32> to vector<8x64xf32>
    %78 = vector.extract_strided_slice %73 {offsets = [0, 192], sizes = [8, 64], strides = [1, 1]} : vector<8x256xf32> to vector<8x64xf32>
    %79 = arith.mulf %76, %62 : vector<8x64xf32>
    %80 = arith.mulf %75, %77 : vector<8x64xf32>
    %81 = arith.addf %79, %80 : vector<8x64xf32>
    %82 = math.tanh %81 : vector<8x64xf32>
    %83 = arith.mulf %78, %82 : vector<8x64xf32>
    %c32 = arith.constant 32 : index
    %c0_21 = arith.constant 0 : index
    %84 = vector.load %arg9[%c32, %c0_21] : memref<72x256xf32, #tpu.memory_space<vmem>>, vector<8x256xf32>
    %85 = arith.truncf %83 : vector<8x64xf32> to vector<8x64xbf16>
    %cst_22 = arith.constant dense<0.000000e+00> : vector<8x256xf32>
    %86 = tpu.matmul %85, %0, %cst_22 {dimension_numbers = #tpu.dot_dimension_numbers<[1], [0], [0], [1], [0, 0, 1, 1], [], []>} : vector<8x64xbf16>, vector<64x256xbf16>, vector<8x256xf32> -> vector<8x256xf32>
    %87 = arith.addf %84, %86 : vector<8x256xf32>
    %88 = arith.negf %87 : vector<8x256xf32>
    %89 = math.exp %88 : vector<8x256xf32>
    %cst_23 = arith.constant 1.000000e+00 : f32
    %90 = vector.broadcast %cst_23 : f32 to vector<8x256xf32>
    %91 = arith.addf %90, %89 : vector<8x256xf32>
    %92 = arith.divf %90, %91 : vector<8x256xf32>
    %93 = math.tanh %87 : vector<8x256xf32>
    %94 = vector.extract_strided_slice %92 {offsets = [0, 0], sizes = [8, 64], strides = [1, 1]} : vector<8x256xf32> to vector<8x64xf32>
    %95 = vector.extract_strided_slice %92 {offsets = [0, 64], sizes = [8, 64], strides = [1, 1]} : vector<8x256xf32> to vector<8x64xf32>
    %96 = vector.extract_strided_slice %93 {offsets = [0, 128], sizes = [8, 64], strides = [1, 1]} : vector<8x256xf32> to vector<8x64xf32>
    %97 = vector.extract_strided_slice %92 {offsets = [0, 192], sizes = [8, 64], strides = [1, 1]} : vector<8x256xf32> to vector<8x64xf32>
    %98 = arith.mulf %95, %81 : vector<8x64xf32>
    %99 = arith.mulf %94, %96 : vector<8x64xf32>
    %100 = arith.addf %98, %99 : vector<8x64xf32>
    %101 = math.tanh %100 : vector<8x64xf32>
    %102 = arith.mulf %97, %101 : vector<8x64xf32>
    %c40 = arith.constant 40 : index
    %c0_24 = arith.constant 0 : index
    %103 = vector.load %arg9[%c40, %c0_24] : memref<72x256xf32, #tpu.memory_space<vmem>>, vector<8x256xf32>
    %104 = arith.truncf %102 : vector<8x64xf32> to vector<8x64xbf16>
    %cst_25 = arith.constant dense<0.000000e+00> : vector<8x256xf32>
    %105 = tpu.matmul %104, %0, %cst_25 {dimension_numbers = #tpu.dot_dimension_numbers<[1], [0], [0], [1], [0, 0, 1, 1], [], []>} : vector<8x64xbf16>, vector<64x256xbf16>, vector<8x256xf32> -> vector<8x256xf32>
    %106 = arith.addf %103, %105 : vector<8x256xf32>
    %107 = arith.negf %106 : vector<8x256xf32>
    %108 = math.exp %107 : vector<8x256xf32>
    %cst_26 = arith.constant 1.000000e+00 : f32
    %109 = vector.broadcast %cst_26 : f32 to vector<8x256xf32>
    %110 = arith.addf %109, %108 : vector<8x256xf32>
    %111 = arith.divf %109, %110 : vector<8x256xf32>
    %112 = math.tanh %106 : vector<8x256xf32>
    %113 = vector.extract_strided_slice %111 {offsets = [0, 0], sizes = [8, 64], strides = [1, 1]} : vector<8x256xf32> to vector<8x64xf32>
    %114 = vector.extract_strided_slice %111 {offsets = [0, 64], sizes = [8, 64], strides = [1, 1]} : vector<8x256xf32> to vector<8x64xf32>
    %115 = vector.extract_strided_slice %112 {offsets = [0, 128], sizes = [8, 64], strides = [1, 1]} : vector<8x256xf32> to vector<8x64xf32>
    %116 = vector.extract_strided_slice %111 {offsets = [0, 192], sizes = [8, 64], strides = [1, 1]} : vector<8x256xf32> to vector<8x64xf32>
    %117 = arith.mulf %114, %100 : vector<8x64xf32>
    %118 = arith.mulf %113, %115 : vector<8x64xf32>
    %119 = arith.addf %117, %118 : vector<8x64xf32>
    %120 = math.tanh %119 : vector<8x64xf32>
    %121 = arith.mulf %116, %120 : vector<8x64xf32>
    %c48 = arith.constant 48 : index
    %c0_27 = arith.constant 0 : index
    %122 = vector.load %arg9[%c48, %c0_27] : memref<72x256xf32, #tpu.memory_space<vmem>>, vector<8x256xf32>
    %123 = arith.truncf %121 : vector<8x64xf32> to vector<8x64xbf16>
    %cst_28 = arith.constant dense<0.000000e+00> : vector<8x256xf32>
    %124 = tpu.matmul %123, %0, %cst_28 {dimension_numbers = #tpu.dot_dimension_numbers<[1], [0], [0], [1], [0, 0, 1, 1], [], []>} : vector<8x64xbf16>, vector<64x256xbf16>, vector<8x256xf32> -> vector<8x256xf32>
    %125 = arith.addf %122, %124 : vector<8x256xf32>
    %126 = arith.negf %125 : vector<8x256xf32>
    %127 = math.exp %126 : vector<8x256xf32>
    %cst_29 = arith.constant 1.000000e+00 : f32
    %128 = vector.broadcast %cst_29 : f32 to vector<8x256xf32>
    %129 = arith.addf %128, %127 : vector<8x256xf32>
    %130 = arith.divf %128, %129 : vector<8x256xf32>
    %131 = math.tanh %125 : vector<8x256xf32>
    %132 = vector.extract_strided_slice %130 {offsets = [0, 0], sizes = [8, 64], strides = [1, 1]} : vector<8x256xf32> to vector<8x64xf32>
    %133 = vector.extract_strided_slice %130 {offsets = [0, 64], sizes = [8, 64], strides = [1, 1]} : vector<8x256xf32> to vector<8x64xf32>
    %134 = vector.extract_strided_slice %131 {offsets = [0, 128], sizes = [8, 64], strides = [1, 1]} : vector<8x256xf32> to vector<8x64xf32>
    %135 = vector.extract_strided_slice %130 {offsets = [0, 192], sizes = [8, 64], strides = [1, 1]} : vector<8x256xf32> to vector<8x64xf32>
    %136 = arith.mulf %133, %119 : vector<8x64xf32>
    %137 = arith.mulf %132, %134 : vector<8x64xf32>
    %138 = arith.addf %136, %137 : vector<8x64xf32>
    %139 = math.tanh %138 : vector<8x64xf32>
    %140 = arith.mulf %135, %139 : vector<8x64xf32>
    %c56 = arith.constant 56 : index
    %c0_30 = arith.constant 0 : index
    %141 = vector.load %arg9[%c56, %c0_30] : memref<72x256xf32, #tpu.memory_space<vmem>>, vector<8x256xf32>
    %142 = arith.truncf %140 : vector<8x64xf32> to vector<8x64xbf16>
    %cst_31 = arith.constant dense<0.000000e+00> : vector<8x256xf32>
    %143 = tpu.matmul %142, %0, %cst_31 {dimension_numbers = #tpu.dot_dimension_numbers<[1], [0], [0], [1], [0, 0, 1, 1], [], []>} : vector<8x64xbf16>, vector<64x256xbf16>, vector<8x256xf32> -> vector<8x256xf32>
    %144 = arith.addf %141, %143 : vector<8x256xf32>
    %145 = arith.negf %144 : vector<8x256xf32>
    %146 = math.exp %145 : vector<8x256xf32>
    %cst_32 = arith.constant 1.000000e+00 : f32
    %147 = vector.broadcast %cst_32 : f32 to vector<8x256xf32>
    %148 = arith.addf %147, %146 : vector<8x256xf32>
    %149 = arith.divf %147, %148 : vector<8x256xf32>
    %150 = math.tanh %144 : vector<8x256xf32>
    %151 = vector.extract_strided_slice %149 {offsets = [0, 0], sizes = [8, 64], strides = [1, 1]} : vector<8x256xf32> to vector<8x64xf32>
    %152 = vector.extract_strided_slice %149 {offsets = [0, 64], sizes = [8, 64], strides = [1, 1]} : vector<8x256xf32> to vector<8x64xf32>
    %153 = vector.extract_strided_slice %150 {offsets = [0, 128], sizes = [8, 64], strides = [1, 1]} : vector<8x256xf32> to vector<8x64xf32>
    %154 = vector.extract_strided_slice %149 {offsets = [0, 192], sizes = [8, 64], strides = [1, 1]} : vector<8x256xf32> to vector<8x64xf32>
    %155 = arith.mulf %152, %138 : vector<8x64xf32>
    %156 = arith.mulf %151, %153 : vector<8x64xf32>
    %157 = arith.addf %155, %156 : vector<8x64xf32>
    %158 = math.tanh %157 : vector<8x64xf32>
    %159 = arith.mulf %154, %158 : vector<8x64xf32>
    %c64 = arith.constant 64 : index
    %c0_33 = arith.constant 0 : index
    %160 = vector.load %arg9[%c64, %c0_33] : memref<72x256xf32, #tpu.memory_space<vmem>>, vector<8x256xf32>
    %161 = arith.truncf %159 : vector<8x64xf32> to vector<8x64xbf16>
    %cst_34 = arith.constant dense<0.000000e+00> : vector<8x256xf32>
    %162 = tpu.matmul %161, %0, %cst_34 {dimension_numbers = #tpu.dot_dimension_numbers<[1], [0], [0], [1], [0, 0, 1, 1], [], []>} : vector<8x64xbf16>, vector<64x256xbf16>, vector<8x256xf32> -> vector<8x256xf32>
    %163 = arith.addf %160, %162 : vector<8x256xf32>
    %164 = arith.negf %163 : vector<8x256xf32>
    %165 = math.exp %164 : vector<8x256xf32>
    %cst_35 = arith.constant 1.000000e+00 : f32
    %166 = vector.broadcast %cst_35 : f32 to vector<8x256xf32>
    %167 = arith.addf %166, %165 : vector<8x256xf32>
    %168 = arith.divf %166, %167 : vector<8x256xf32>
    %169 = math.tanh %163 : vector<8x256xf32>
    %170 = vector.extract_strided_slice %168 {offsets = [0, 0], sizes = [8, 64], strides = [1, 1]} : vector<8x256xf32> to vector<8x64xf32>
    %171 = vector.extract_strided_slice %168 {offsets = [0, 64], sizes = [8, 64], strides = [1, 1]} : vector<8x256xf32> to vector<8x64xf32>
    %172 = vector.extract_strided_slice %169 {offsets = [0, 128], sizes = [8, 64], strides = [1, 1]} : vector<8x256xf32> to vector<8x64xf32>
    %173 = vector.extract_strided_slice %168 {offsets = [0, 192], sizes = [8, 64], strides = [1, 1]} : vector<8x256xf32> to vector<8x64xf32>
    %174 = arith.mulf %171, %157 : vector<8x64xf32>
    %175 = arith.mulf %170, %172 : vector<8x64xf32>
    %176 = arith.addf %174, %175 : vector<8x64xf32>
    %177 = math.tanh %176 : vector<8x64xf32>
    %178 = arith.mulf %173, %177 : vector<8x64xf32>
    %179 = vector.extract_strided_slice %178 {offsets = [0, 32], sizes = [8, 32], strides = [1, 1]} : vector<8x64xf32> to vector<8x32xf32>
    %180 = arith.truncf %179 : vector<8x32xf32> to vector<8x32xbf16>
    %c0_36 = arith.constant 0 : index
    %c0_37 = arith.constant 0 : index
    %181 = vector.load %arg4[%c0_36, %c0_37] : memref<32x16xbf16, #tpu.memory_space<vmem>>, vector<32x16xbf16>
    %cst_38 = arith.constant dense<0.000000e+00> : vector<8x16xf32>
    %182 = tpu.matmul %180, %181, %cst_38 {dimension_numbers = #tpu.dot_dimension_numbers<[1], [0], [0], [1], [0, 0, 1, 1], [], []>} : vector<8x32xbf16>, vector<32x16xbf16>, vector<8x16xf32> -> vector<8x16xf32>
    %c0_39 = arith.constant 0 : index
    %c0_40 = arith.constant 0 : index
    %183 = vector.load %arg5[%c0_39, %c0_40] : memref<1x16xf32, #tpu.memory_space<vmem>>, vector<1x16xf32>
    %184 = vector.broadcast %183 : vector<1x16xf32> to vector<8x16xf32>
    %185 = arith.addf %182, %184 : vector<8x16xf32>
    %cst_41 = arith.constant 0.000000e+00 : f32
    %186 = vector.broadcast %cst_41 : f32 to vector<8x16xf32>
    %187 = arith.maximumf %185, %186 : vector<8x16xf32>
    %c0_42 = arith.constant 0 : index
    %c0_43 = arith.constant 0 : index
    %188 = vector.load %arg6[%c0_42, %c0_43] : memref<1x16xf32, #tpu.memory_space<vmem>>, vector<1x16xf32>
    %189 = vector.broadcast %188 : vector<1x16xf32> to vector<8x16xf32>
    %190 = arith.mulf %187, %189 : vector<8x16xf32>
    %cst_44 = arith.constant dense<0.000000e+00> : vector<8xf32>
    %191 = vector.multi_reduction <add>, %190, %cst_44 [1] : vector<8x16xf32> to vector<8xf32>
    %192 = vector.shape_cast %191 : vector<8xf32> to vector<8x1xf32>
    %c0_45 = arith.constant 0 : index
    %c0_46 = arith.constant 0 : index
    %193 = vector.load %arg7[%c0_45, %c0_46] : memref<1x1xf32, #tpu.memory_space<vmem>>, vector<1x1xf32>
    %194 = vector.broadcast %193 : vector<1x1xf32> to vector<8x1xf32>
    %195 = arith.addf %192, %194 : vector<8x1xf32>
    %196 = vector.shape_cast %195 : vector<8x1xf32> to vector<8x1xf32>
    %197 = vector.broadcast %196 : vector<8x1xf32> to vector<8x128xf32>
    %c0_47 = arith.constant 0 : index
    %c0_48 = arith.constant 0 : index
    %198 = vector.load %arg8[%c0_47, %c0_48] : memref<8x128xf32, #tpu.memory_space<vmem>>, vector<8x128xf32>
    tpu.vector_store %arg8[%c0_47, %c0_48], %197 {strides = array<i32>} : memref<8x128xf32, #tpu.memory_space<vmem>>, vector<8x128xf32>,
    return
  }
}

</mosaic_0001>

<bundles_post_ra>
// kernel: tpu_custom_call.1
= control target key start
LH: loop header
LB: loop body
LE: loop exit
PB: predicated region body
PF: predicated region fallthrough
CT: control target
= control target key end

     0   :  { %s1532_s0 = inlined_call_operand.vmem [shape: bf16[72,4], index: 0, kind: input, shape index: {}]   ;;  %s1533_s1 = inlined_call_operand.vmem [shape: bf16[4,256], index: 1, kind: input, shape index: {}]   ;;  %s1534_s2 = inlined_call_operand.vmem [shape: f32[1,256], index: 2, kind: input, shape index: {}]   ;;  %s1535_s3 = inlined_call_operand.vmem [shape: bf16[64,256], index: 3, kind: input, shape index: {}]   ;;  %s1536_s4 = inlined_call_operand.vmem [shape: bf16[32,16], index: 4, kind: input, shape index: {}]   ;;  %s1537_s5 = inlined_call_operand.vmem [shape: f32[1,16], index: 5, kind: input, shape index: {}]   ;;  %s1538_s6 = inlined_call_operand.vmem [shape: f32[1,16], index: 6, kind: input, shape index: {}]   ;;  %s1539_s7 = inlined_call_operand.<no memory space> [shape: f32[1,1], index: 7, kind: input, shape index: {}]   ;;  %s1540_s8 = inlined_call_operand.hbm [shape: f32[8,128], index: 8, kind: output, shape index: {}]  }
   0x1   :  { %v13_v0 = vstv %s1539_s7 }
   0x2   :  { %14 = vst [vmem:[#allocation3] sm:$0x1] %v13_v0 }
   0x3   :  { %v999_v1 = vld.sshfl [vmem:[%s1533_s1] sm:$0x33 pattern:$0x76325410]  ;;  %vm111_vm0 = vcmask 1041408   ;;  %v1222_v4 = vmov 0  }
   0x4   :  { %v94_v2 = vcombine.high %v999_v1, %v999_v1  ;;  %v113_v3 = vsel %vm111_vm0, %v999_v1, 0  ;;  %150 = vmatprep.mubr.bf16.mxu0 %v1222_v4  ;;  %180 = vmatprep.mubr.bf16.mxu1 %v1222_v4  ;;  %v1071_v5 = vld [vmem:[%s1532_s0] sm:$0xff]   ;;  %vm95_vm1 = vcmask 31744  }
   0x5   :  { %1070 = vset.pattern.permute.xlu0 %v1222_v4 }
   0x6   :  { %1000 = vmatprep.subr.msk.bf16.mxu0 %vm111_vm0, %v94_v2  ;;  %1058 = vmatprep.subr.msk.bf16.mxu1 %vm111_vm0, %v94_v2 }
   0x7   :  { %119 = vmatpush1.bf16.msra.mxu0 %v113_v3  ;;  %1059 = vmatpush1.bf16.msra.mxu1 %v113_v3 }
   0xa   :  { %1001 = vmatmul.mubr.msk.bf16.vlgmr.msra.gmra.mrb[0].mxu0 %vm95_vm1, %v1071_v5 }
   0xb   :  { %160 = vmatprep.mubr.bf16.mxu0 %v1222_v4 }
   0xc   :  { %15 = vsyncpa [#allocation5], 0  ;;  %v53_v6 = vlaneseq  ;;  %v51_v9 = vld [vmem:[%s1534_s2] sm:$0x3]  ;;  %v1223_v25 = vmov 0.0   ;;  %s1224_s2 = smov 64  }
   0xd   :  { %v1072_v29 = vld [vmem:[%s1532_s0 + $0x18] sm:$0xff]   ;;  %v1308_v30 = vld [vmem:[%s1535_s3 + $0x4] ss:$8 sps:$4 sm:$0xff]   ;;  %v1313_v31 = vld [vmem:[%s1535_s3] ss:$8 sps:$4 sm:$0xff]   ;;  %vm291_vm3 = vcmask 523264  }
   0xe   :  { %v54_v7 = vshrl.u32 %v53_v6, 7  ;;  %v218_v22 = vand.u32 127, %v53_v6  ;;  %v1318_v32 = vld [vmem:[%s1535_s3 + $0x14] ss:$8 sps:$4 sm:$0xff]   ;;  %1004 = vmatmul.mubr.msk.bf16.vlgmr.msra.gmra.mrb[0].mxu1 %vm95_vm1, %v1072_v29  ;;  %295 = vmatprep.subr.bf16.mxu1 %v1308_v30  ;;  %v1327_v33 = vld [vmem:[%s1535_s3 + $0x10] ss:$8 sps:$4 sm:$0xff]  }
   0xf   :  { %296 = vmatpush1.bf16.msra.mxu1 %v1313_v31  ;;  %190 = vmatprep.mubr.bf16.mxu1 %v1222_v4  ;;  %v1333_v34 = vld [vmem:[%s1535_s3 + $0x24] ss:$8 sps:$4 sm:$0xff]   ;;  %v1079_v35 = vld [vmem:[%s1532_s0 + $0x20] ss:$0 sps:$4 sm:$0xff]   ;;  %v1351_v38 = vld [vmem:[%s1535_s3 + $0x34] ss:$8 sps:$4 sm:$0xff]  }
  0x10   :  { %v55_v8 = vsub.s32 0, %v54_v7  ;;  %v59_v17 = vsub.s32 1, %v54_v7  ;;  %vm219_vm2 = vcmp.lt.s32.totalorder %v218_v22, 32  ;;  %297 = vmatprep.subr.bf16.mxu1 %v1318_v32  ;;  %447 = vmatprep.subr.bf16.mxu0 %v1308_v30  ;;  %v1345_v36 = vld [vmem:[%s1535_s3 + $0x20] ss:$8 sps:$4 sm:$0xff]   ;;  %vm1225_vm4 = vmmov 0  }
  0x11   :  { %v1006_v26 = vsel %vm219_vm2, 1.0, %v1223_v25  ;;  %448 = vmatpush1.bf16.msra.mxu0 %v1313_v31  ;;  %v1361_v39 = vld [vmem:[%s1535_s3 + $0x30] ss:$8 sps:$4 sm:$0xff]   ;;  %v1086_v7 = vld [vmem:[%s1532_s0 + $0x8] sm:$0xff]   ;;  %vm909_vm5 = vcmask 261120   ;;  %vm962_vm6 = vcmask 130048  }
  0x12   :  { %v1290_v10 = vrot.slane %v51_v9, %v55_v8  ;;  %v1297_v18 = vrot.slane %v51_v9, %v59_v17  ;;  %449 = vmatprep.subr.bf16.mxu0 %v1318_v32  ;;  %1002 = vmatmul.mubr.msk.bf16.gmra.mrb[4].mxu0 %vm95_vm1, %v1086_v7  ;;  %s1227_s16 = smov [#allocation4]  }
  0x13   :  { %298 = vmatpush1.bf16.msra.mxu1 %v1327_v33  ;;  %170 = vmatprep.mubr.bf16.mxu0 %v1222_v4 }
  0x14   :  { %299 = vmatprep.subr.bf16.mxu1 %v1333_v34 }
  0x15   :  { %450 = vmatpush1.bf16.msra.mxu0 %v1327_v33 }
  0x16   :  { %1005 = vmatmul.mubr.msk.bf16.gmra.mrb[4].mxu1 %vm95_vm1, %v1079_v35  ;;  %451 = vmatprep.subr.bf16.mxu0 %v1333_v34 }
  0x17   :  { %300 = vmatpush1.bf16.msra.mxu1 %v1345_v36  ;;  %327 = vmatprep.mubr.bf16.mxu1 %v1222_v4 }
  0x18   :  { %301 = vmatprep.subr.bf16.mxu1 %v1351_v38 }
  0x19   :  { %452 = vmatpush1.bf16.msra.mxu0 %v1345_v36 }
  0x1a   :  { %453 = vmatprep.subr.bf16.mxu0 %v1351_v38 }
  0x1b   :  { %302 = vmatpush1.bf16.msra.mxu1 %v1361_v39 }
  0x1c   :  { %373 = vmatprep.subr.bf16.mxu1 %v1308_v30 }
  0x1d   :  { %454 = vmatpush1.bf16.msra.mxu0 %v1361_v39 }
  0x1e   :  { %595 = vmatprep.subr.bf16.mxu0 %v1308_v30 }
  0xdd   :  { %v152_v11 = vpop.f32.mrb[0].mxu0 }
  0xde   :  { %v153_v12 = vadd.f32 %v152_v11, %v1290_v10  ;;  %v154_v13 = vpop.f32.mrb[1].mxu0 }
  0xdf   :  { %v1293_v14 = vpop.f32.mrb[2].mxu0  ;;  %v155_v19 = vadd.f32 %v154_v13, %v1297_v18 }
  0xe0   :  { %v1007_v15 = vmul.f32 -1.442695, %v153_v12  ;;  %v1295_v16 = vpop.f32.mrb[3].mxu0  ;;  %v157_v56 = vadd.f32 %v1293_v14, %v1290_v10 }
  0xe1   :  { %v1008_v40 = vmul.f32 -1.442695, %v155_v19  ;;  %v1372_v47 = vpop.f32.mrb[0].mxu1  ;;  %v159_v57 = vadd.f32 %v1295_v16, %v1297_v18 }
  0xe2   :  { %1090 = vpow2.f32 %v1007_v15  ;;  %v1374_v48 = vpop.f32.mrb[1].mxu1 }
  0xe3   :  { %1092 = vtanh.f32 %v155_v19  ;;  %v1376_v49 = vpop.f32.mrb[2].mxu1 }
  0xe4   :  { %v1378_v50 = vpop.f32.mrb[3].mxu1 }
  0xe9   :  { %v1380_v51 = vpop.f32.mrb[4].mxu1 }
  0xea   :  { %v1382_v52 = vpop.f32.mrb[5].mxu1 }
  0xeb   :  { %v196_v53 = vpop.f32.mrb[6].mxu1 }
  0xec   :  { %v1091_v20 = vpop.eup %1090  ;;  %v197_v54 = vpop.f32.mrb[7].mxu1 }
  0xed   :  { %v230_v21 = vadd.f32 1.0, %v1091_v20  ;;  %v1093_v23 = vpop.eup %1092 }
  0xef   :  { %1094 = vrcp.f32 %v230_v21  ;;  %v162_v21 = vpop.f32.mrb[4].mxu0 }
  0xf0   :  { %v164_v22 = vpop.f32.mrb[5].mxu0 }
  0xf9   :  { %v1095_v24 = vpop.eup %1094 }
  0xfa   :  { %v237_v27 = vmul.f32 %v1095_v24, %v1093_v23  ;;  %v1405_v23 = vpop.f32.mrb[6].mxu0 }
  0xfb   :  { %v1407_v24 = vpop.f32.mrb[7].mxu0 }
  0xfc   :  { %v238_v28 = vmul.f32 %v1006_v26, %v237_v27  ;;  %v163_v27 = vadd.f32 %v162_v21, %v1290_v10 }
  0xfe   :  { %352 = vrot.lane.b32.xlu1 %v238_v28, %s1224_s2  ;;  %1096 = vtanh.f32 %v238_v28  ;;  %v165_v28 = vadd.f32 %v164_v22, %v1297_v18 }
  0xff   :  { %1098 = vpow2.f32 %v1008_v40 }
 0x108   :  { %v1097_v37 = vpop.eup %1096 }
 0x109   :  { %241 = vrot.lane.b32.xlu0 %v1097_v37, %s1224_s2  ;;  %v1099_v41 = vpop.eup %1098 }
 0x10a   :  { %v231_v42 = vadd.f32 1.0, %v1099_v41 }
 0x10c   :  { %1100 = vrcp.f32 %v231_v42 }
 0x116   :  { %v1101_v43 = vpop.eup %1100 }
 0x170   :  { %v353_v11 = vpop.permute.xlu1 %352 }
 0x17b   :  { %v242_v44 = vpop.permute.xlu0 %241 }
 0x17c   :  { %v244_v45 = vmul.f32 %v1101_v43, %v242_v44 }
 0x17e   :  { %v247_v46 = vpack.c.bf16 %v244_v45, %v244_v45 }
 0x180   :  { %249 = vrot.lane.b32.xlu0 %v247_v46, %s1224_s2 }
 0x1f2   :  { %v250_v55 = vpop.permute.xlu0 %249 }
 0x1f3   :  { %1017 = vmatmul.mubr.msk.bf16.vlgmr.msra.gmra.mrb[8].mxu1 %vm291_vm3, %v250_v55  ;;  %v1087_v55 = vld [vmem:[%s1532_s0 + $0x10] sm:$0xff]  }
 0x1f4   :  { %374 = vmatpush1.bf16.msra.mxu1 %v1313_v31  ;;  %405 = vmatprep.mubr.bf16.mxu1 %v1222_v4 }
 0x1f5   :  { %375 = vmatprep.subr.bf16.mxu1 %v1318_v32  ;;  %1003 = vmatmul.mubr.msk.bf16.gmra.mrb[8].mxu0 %vm95_vm1, %v1087_v55 }
 0x1f6   :  { %479 = vmatprep.mubr.bf16.mxu0 %v1222_v4 }
 0x1f8   :  { %376 = vmatpush1.bf16.msra.mxu1 %v1327_v33 }
 0x1f9   :  { %377 = vmatprep.subr.bf16.mxu1 %v1333_v34 }
 0x1fc   :  { %378 = vmatpush1.bf16.msra.mxu1 %v1345_v36 }
 0x1fd   :  { %379 = vmatprep.subr.bf16.mxu1 %v1351_v38 }
 0x200   :  { %380 = vmatpush1.bf16.msra.mxu1 %v1361_v39 }
 0x201   :  { %521 = vmatprep.subr.bf16.mxu1 %v1308_v30 }
 0x2c6   :  { %v329_v58 = vpop.f32.mrb[8].mxu1 }
 0x2c7   :  { %v336_v59 = vadd.f32 %v329_v58, %v157_v56  ;;  %v331_v60 = vpop.f32.mrb[9].mxu1 }
 0x2c8   :  { %v337_v61 = vadd.f32 %v331_v60, %v159_v57  ;;  %v333_v62 = vpop.f32.mrb[10].mxu1 }
 0x2c9   :  { %v1018_v63 = vmul.f32 -1.442695, %v336_v59  ;;  %v334_v0 = vpop.f32.mrb[11].mxu1 }
 0x2ca   :  { %v1019_v8 = vmul.f32 -1.442695, %v337_v61 }
 0x2cb   :  { %1102 = vpow2.f32 %v1018_v63 }
 0x2cc   :  { %1104 = vtanh.f32 %v337_v61 }
 0x2d5   :  { %v1103_v1 = vpop.eup %1102 }
 0x2d6   :  { %v344_v2 = vadd.f32 1.0, %v1103_v1  ;;  %v1105_v3 = vpop.eup %1104 }
 0x2d8   :  { %1106 = vrcp.f32 %v344_v2  ;;  %v172_v2 = vpop.f32.mrb[8].mxu0 }
 0x2d9   :  { %1108 = vpow2.f32 %v1019_v8  ;;  %v167_v8 = vadd.f32 %v1405_v23, %v1290_v10 }
 0x2e2   :  { %v1107_v5 = vpop.eup %1106 }
 0x2e3   :  { %v356_v6 = vmul.f32 %v1107_v5, %v1105_v3  ;;  %v1109_v9 = vpop.eup %1108  ;;  %v355_v13 = vmul.f32 %v1107_v5, %v353_v11  ;;  %v174_v3 = vpop.f32.mrb[9].mxu0 }
 0x2e4   :  { %v345_v12 = vadd.f32 1.0, %v1109_v9  ;;  %v1428_v5 = vpop.f32.mrb[10].mxu0  ;;  %v169_v9 = vadd.f32 %v1407_v24, %v1297_v18 }
 0x2e5   :  { %358 = vrot.lane.b32.xlu1 %v356_v6, %s1224_s2  ;;  %v1430_v6 = vpop.f32.mrb[11].mxu0 }
 0x2e6   :  { %1110 = vrcp.f32 %v345_v12 }
 0x2f0   :  { %v1111_v16 = vpop.eup %1110 }
 0x357   :  { %v359_v14 = vpop.permute.xlu1 %358 }
 0x358   :  { %v361_v15 = vadd.f32 %v359_v14, %v355_v13 }
 0x35a   :  { %1112 = vtanh.f32 %v361_v15 }
 0x364   :  { %v1113_v17 = vpop.eup %1112 }
 0x365   :  { %v363_v19 = vmul.f32 %v1113_v17, %v1111_v16 }
 0x367   :  { %v366_v20 = vpack.c.bf16 %v363_v19, %v363_v19 }
 0x369   :  { %368 = vrot.lane.b32.xlu0 %v366_v20, %s1224_s2 }
 0x3db   :  { %v369_v26 = vpop.permute.xlu0 %368 }
 0x3dc   :  { %1020 = vmatmul.mubr.msk.bf16.vlgmr.msra.gmra.mrb[12].mxu1 %vm291_vm3, %v369_v26 }
 0x3dd   :  { %522 = vmatpush1.bf16.msra.mxu1 %v1313_v31  ;;  %553 = vmatprep.mubr.bf16.mxu1 %v1222_v4 }
 0x3de   :  { %523 = vmatprep.subr.bf16.mxu1 %v1318_v32 }
 0x3e1   :  { %524 = vmatpush1.bf16.msra.mxu1 %v1327_v33 }
 0x3e2   :  { %525 = vmatprep.subr.bf16.mxu1 %v1333_v34 }
 0x3e5   :  { %526 = vmatpush1.bf16.msra.mxu1 %v1345_v36 }
 0x3e6   :  { %527 = vmatprep.subr.bf16.mxu1 %v1351_v38 }
 0x3e9   :  { %528 = vmatpush1.bf16.msra.mxu1 %v1361_v39 }
 0x3ea   :  { %669 = vmatprep.subr.bf16.mxu1 %v1308_v30 }
 0x4af   :  { %v407_v29 = vpop.f32.mrb[12].mxu1 }
 0x4b0   :  { %v414_v35 = vadd.f32 %v407_v29, %v163_v27  ;;  %v409_v37 = vpop.f32.mrb[13].mxu1 }
 0x4b1   :  { %v415_v40 = vadd.f32 %v409_v37, %v165_v28  ;;  %v411_v41 = vpop.f32.mrb[14].mxu1 }
 0x4b2   :  { %v1021_v42 = vmul.f32 -1.442695, %v414_v35  ;;  %v412_v43 = vpop.f32.mrb[15].mxu1 }
 0x4b3   :  { %v1022_v56 = vmul.f32 -1.442695, %v415_v40 }
 0x4b4   :  { %1114 = vpow2.f32 %v1021_v42 }
 0x4b5   :  { %1116 = vtanh.f32 %v415_v40 }
 0x4be   :  { %v1115_v44 = vpop.eup %1114 }
 0x4bf   :  { %v422_v45 = vadd.f32 1.0, %v1115_v44  ;;  %v1117_v46 = vpop.eup %1116  ;;  %v173_v44 = vadd.f32 %v172_v2, %v1290_v10 }
 0x4c1   :  { %1118 = vrcp.f32 %v422_v45  ;;  %v175_v45 = vadd.f32 %v174_v3, %v1297_v18 }
 0x4c2   :  { %1120 = vpow2.f32 %v1022_v56 }
 0x4cb   :  { %v1119_v53 = vpop.eup %1118 }
 0x4cc   :  { %v430_v54 = vmul.f32 %v1119_v53, %v1117_v46  ;;  %v1121_v57 = vpop.eup %1120  ;;  %v429_v59 = vmul.f32 %v1119_v53, %v361_v15 }
 0x4cd   :  { %v423_v58 = vadd.f32 1.0, %v1121_v57 }
 0x4ce   :  { %432 = vrot.lane.b32.xlu1 %v430_v54, %s1224_s2 }
 0x4cf   :  { %1122 = vrcp.f32 %v423_v58 }
 0x4d9   :  { %v1123_v62 = vpop.eup %1122 }
 0x540   :  { %v433_v60 = vpop.permute.xlu1 %432 }
 0x541   :  { %v435_v61 = vadd.f32 %v433_v60, %v429_v59 }
 0x543   :  { %1124 = vtanh.f32 %v435_v61 }
 0x54d   :  { %v1125_v63 = vpop.eup %1124 }
 0x54e   :  { %v437_v0 = vmul.f32 %v1125_v63, %v1123_v62 }
 0x550   :  { %v440_v1 = vpack.c.bf16 %v437_v0, %v437_v0 }
 0x552   :  { %442 = vrot.lane.b32.xlu0 %v440_v1, %s1224_s2 }
 0x5c4   :  { %v443_v7 = vpop.permute.xlu0 %442 }
 0x5c5   :  { %1023 = vmatmul.mubr.msk.bf16.vlgmr.msra.gmra.mrb[12].mxu0 %vm291_vm3, %v443_v7 }
 0x5c6   :  { %596 = vmatpush1.bf16.msra.mxu0 %v1313_v31  ;;  %627 = vmatprep.mubr.bf16.mxu0 %v1222_v4 }
 0x5c7   :  { %597 = vmatprep.subr.bf16.mxu0 %v1318_v32 }
 0x5ca   :  { %598 = vmatpush1.bf16.msra.mxu0 %v1327_v33 }
 0x5cb   :  { %599 = vmatprep.subr.bf16.mxu0 %v1333_v34 }
 0x5ce   :  { %600 = vmatpush1.bf16.msra.mxu0 %v1345_v36 }
 0x5cf   :  { %601 = vmatprep.subr.bf16.mxu0 %v1351_v38 }
 0x5d2   :  { %602 = vmatpush1.bf16.msra.mxu0 %v1361_v39 }
 0x5d3   :  { %743 = vmatprep.subr.bf16.mxu0 %v1308_v30 }
 0x698   :  { %v481_v11 = vpop.f32.mrb[12].mxu0 }
 0x699   :  { %v488_v12 = vadd.f32 %v481_v11, %v167_v8  ;;  %v483_v13 = vpop.f32.mrb[13].mxu0 }
 0x69a   :  { %v489_v14 = vadd.f32 %v483_v13, %v169_v9  ;;  %v485_v15 = vpop.f32.mrb[14].mxu0 }
 0x69b   :  { %v1024_v16 = vmul.f32 -1.442695, %v488_v12  ;;  %v486_v17 = vpop.f32.mrb[15].mxu0  ;;  %v177_v15 = vadd.f32 %v1428_v5, %v1290_v10 }
 0x69c   :  { %v1025_v23 = vmul.f32 -1.442695, %v489_v14 }
 0x69d   :  { %1126 = vpow2.f32 %v1024_v16  ;;  %v179_v16 = vadd.f32 %v1430_v6, %v1297_v18 }
 0x69e   :  { %1128 = vtanh.f32 %v489_v14 }
 0x6a7   :  { %v1127_v19 = vpop.eup %1126 }
 0x6a8   :  { %v496_v20 = vadd.f32 1.0, %v1127_v19  ;;  %v1129_v21 = vpop.eup %1128 }
 0x6aa   :  { %1130 = vrcp.f32 %v496_v20 }
 0x6ab   :  { %1132 = vpow2.f32 %v1025_v23 }
 0x6b4   :  { %v1131_v22 = vpop.eup %1130 }
 0x6b5   :  { %v504_v26 = vmul.f32 %v1131_v22, %v1129_v21  ;;  %v1133_v24 = vpop.eup %1132  ;;  %v503_v28 = vmul.f32 %v1131_v22, %v435_v61 }
 0x6b6   :  { %v497_v27 = vadd.f32 1.0, %v1133_v24 }
 0x6b7   :  { %506 = vrot.lane.b32.xlu1 %v504_v26, %s1224_s2 }
 0x6b8   :  { %1134 = vrcp.f32 %v497_v27 }
 0x6c2   :  { %v1135_v37 = vpop.eup %1134 }
 0x729   :  { %v507_v29 = vpop.permute.xlu1 %506 }
 0x72a   :  { %v509_v35 = vadd.f32 %v507_v29, %v503_v28 }
 0x72c   :  { %1136 = vtanh.f32 %v509_v35 }
 0x736   :  { %v1137_v40 = vpop.eup %1136 }
 0x737   :  { %v511_v41 = vmul.f32 %v1137_v40, %v1135_v37 }
 0x739   :  { %v514_v42 = vpack.c.bf16 %v511_v41, %v511_v41 }
 0x73b   :  { %516 = vrot.lane.b32.xlu0 %v514_v42, %s1224_s2 }
 0x7ad   :  { %v517_v43 = vpop.permute.xlu0 %516 }
 0x7ae   :  { %1026 = vmatmul.mubr.msk.bf16.vlgmr.msra.gmra.mrb[16].mxu1 %vm291_vm3, %v517_v43 }
 0x7af   :  { %670 = vmatpush1.bf16.msra.mxu1 %v1313_v31  ;;  %701 = vmatprep.mubr.bf16.mxu1 %v1222_v4 }
 0x7b0   :  { %671 = vmatprep.subr.bf16.mxu1 %v1318_v32 }
 0x7b3   :  { %672 = vmatpush1.bf16.msra.mxu1 %v1327_v33 }
 0x7b4   :  { %673 = vmatprep.subr.bf16.mxu1 %v1333_v34 }
 0x7b7   :  { %674 = vmatpush1.bf16.msra.mxu1 %v1345_v36 }
 0x7b8   :  { %675 = vmatprep.subr.bf16.mxu1 %v1351_v38 }
 0x7bb   :  { %676 = vmatpush1.bf16.msra.mxu1 %v1361_v39 }
 0x7bc   :  { %1050 = vmatprep.subr.bf16.mxu1 %v1223_v25 }
 0x881   :  { %v555_v46 = vpop.f32.mrb[16].mxu1 }
 0x882   :  { %v562_v53 = vadd.f32 %v555_v46, %v173_v44  ;;  %v557_v54 = vpop.f32.mrb[17].mxu1 }
 0x883   :  { %v563_v55 = vadd.f32 %v557_v54, %v175_v45  ;;  %v559_v56 = vpop.f32.mrb[18].mxu1  ;;  %v185_v54 = vadd.f32 %v1374_v48, %v1297_v18 }
 0x884   :  { %v1027_v57 = vmul.f32 -1.442695, %v562_v53  ;;  %v560_v58 = vpop.f32.mrb[19].mxu1  ;;  %v183_v53 = vadd.f32 %v1372_v47, %v1290_v10 }
 0x885   :  { %v1028_v0 = vmul.f32 -1.442695, %v563_v55 }
 0x886   :  { %1138 = vpow2.f32 %v1027_v57 }
 0x887   :  { %1140 = vtanh.f32 %v563_v55 }
 0x890   :  { %v1139_v59 = vpop.eup %1138 }
 0x891   :  { %v570_v60 = vadd.f32 1.0, %v1139_v59  ;;  %v1141_v61 = vpop.eup %1140 }
 0x893   :  { %1142 = vrcp.f32 %v570_v60 }
 0x894   :  { %1144 = vpow2.f32 %v1028_v0 }
 0x89d   :  { %v1143_v62 = vpop.eup %1142 }
 0x89e   :  { %v578_v63 = vmul.f32 %v1143_v62, %v1141_v61  ;;  %v1145_v1 = vpop.eup %1144  ;;  %v577_v3 = vmul.f32 %v1143_v62, %v509_v35 }
 0x89f   :  { %v571_v2 = vadd.f32 1.0, %v1145_v1 }
 0x8a0   :  { %580 = vrot.lane.b32.xlu1 %v578_v63, %s1224_s2 }
 0x8a1   :  { %1146 = vrcp.f32 %v571_v2 }
 0x8ab   :  { %v1147_v9 = vpop.eup %1146 }
 0x912   :  { %v581_v7 = vpop.permute.xlu1 %580 }
 0x913   :  { %v583_v8 = vadd.f32 %v581_v7, %v577_v3 }
 0x915   :  { %1148 = vtanh.f32 %v583_v8 }
 0x91f   :  { %v1149_v11 = vpop.eup %1148 }
 0x920   :  { %v585_v12 = vmul.f32 %v1149_v11, %v1147_v9 }
 0x922   :  { %v588_v13 = vpack.c.bf16 %v585_v12, %v585_v12 }
 0x924   :  { %590 = vrot.lane.b32.xlu0 %v588_v13, %s1224_s2 }
 0x996   :  { %v591_v14 = vpop.permute.xlu0 %590 }
 0x997   :  { %1029 = vmatmul.mubr.msk.bf16.vlgmr.msra.gmra.mrb[16].mxu0 %vm291_vm3, %v591_v14 }
 0x998   :  { %744 = vmatpush1.bf16.msra.mxu0 %v1313_v31  ;;  %775 = vmatprep.mubr.bf16.mxu0 %v1222_v4 }
 0x999   :  { %745 = vmatprep.subr.bf16.mxu0 %v1318_v32 }
 0x99c   :  { %746 = vmatpush1.bf16.msra.mxu0 %v1327_v33 }
 0x99d   :  { %747 = vmatprep.subr.bf16.mxu0 %v1333_v34 }
 0x9a0   :  { %748 = vmatpush1.bf16.msra.mxu0 %v1345_v36 }
 0x9a1   :  { %749 = vmatprep.subr.bf16.mxu0 %v1351_v38 }
 0x9a4   :  { %750 = vmatpush1.bf16.msra.mxu0 %v1361_v39 }
 0x9a5   :  { %817 = vmatprep.subr.bf16.mxu0 %v1308_v30 }
 0xa6a   :  { %v629_v17 = vpop.f32.mrb[16].mxu0 }
 0xa6b   :  { %v636_v19 = vadd.f32 %v629_v17, %v177_v15  ;;  %v631_v20 = vpop.f32.mrb[17].mxu0 }
 0xa6c   :  { %v637_v21 = vadd.f32 %v631_v20, %v179_v16  ;;  %v633_v22 = vpop.f32.mrb[18].mxu0  ;;  %v187_v16 = vadd.f32 %v1376_v49, %v1290_v10 }
 0xa6d   :  { %v1030_v26 = vmul.f32 -1.442695, %v636_v19  ;;  %v634_v23 = vpop.f32.mrb[19].mxu0 }
 0xa6e   :  { %v1031_v5 = vmul.f32 -1.442695, %v637_v21 }
 0xa6f   :  { %1150 = vpow2.f32 %v1030_v26 }
 0xa70   :  { %1152 = vtanh.f32 %v637_v21 }
 0xa79   :  { %v1151_v24 = vpop.eup %1150 }
 0xa7a   :  { %v644_v27 = vadd.f32 1.0, %v1151_v24  ;;  %v1153_v28 = vpop.eup %1152 }
 0xa7c   :  { %1154 = vrcp.f32 %v644_v27 }
 0xa7d   :  { %1156 = vpow2.f32 %v1031_v5 }
 0xa86   :  { %v1155_v30 = vpop.eup %1154 }
 0xa87   :  { %v652_v29 = vmul.f32 %v1155_v30, %v1153_v28  ;;  %v1157_v6 = vpop.eup %1156  ;;  %v651_v37 = vmul.f32 %v1155_v30, %v583_v8 }
 0xa88   :  { %v645_v35 = vadd.f32 1.0, %v1157_v6 }
 0xa89   :  { %654 = vrot.lane.b32.xlu1 %v652_v29, %s1224_s2 }
 0xa8a   :  { %1158 = vrcp.f32 %v645_v35  ;;  %v193_v35 = vadd.f32 %v1380_v51, %v1290_v10  ;;  %v1088_v10 = vld [vmem:[%s1536_s4] sm:$0xff]  }
 0xa94   :  { %v1159_v42 = vpop.eup %1158 }
 0xafb   :  { %v655_v40 = vpop.permute.xlu1 %654 }
 0xafc   :  { %v657_v41 = vadd.f32 %v655_v40, %v651_v37  ;;  %v195_v37 = vadd.f32 %v1382_v52, %v1297_v18 }
 0xafe   :  { %1160 = vtanh.f32 %v657_v41 }
 0xb08   :  { %v1161_v43 = vpop.eup %1160 }
 0xb09   :  { %v659_v44 = vmul.f32 %v1161_v43, %v1159_v42 }
 0xb0b   :  { %v662_v45 = vpack.c.bf16 %v659_v44, %v659_v44 }
 0xb0d   :  { %664 = vrot.lane.b32.xlu0 %v662_v45, %s1224_s2 }
 0xb7f   :  { %v665_v46 = vpop.permute.xlu0 %664 }
 0xb80   :  { %1032 = vmatmul.mubr.msk.bf16.vlgmr.msra.gmra.mrb[20].mxu1 %vm291_vm3, %v665_v46 }
 0xb81   :  { %1054 = vmatprep.mubr.msk.bf16.mxu1 %vm1225_vm4, %v1223_v25  ;;  %1051 = vmatpush3.bf16.msra.mxu1 %v1088_v10 }
 0xb82   :  { %1052 = vmatprep.subr.bf16.mxu1 %v1223_v25  ;;  %v1041_v25 = vld [vmem:[%s1537_s5] ss:$0 sm:$0xff]  ;;  %s986_s5 = sshll.u32 %s1227_s16, 4  ;;  %s987_s5 = int_to_ptr.vmem [resolvable:$true] %s986_s5 }
 0xb83   :  { %s1198_s17 = scalar_lea.vmem %s987_s5, 128  ;;  %p1203_p1 = scmp.lt.s32.totalorder %s987_s5, %s987_s5 }
 0xb84   :  { %p1199_p0 = scmp.ne.s32.totalorder %s987_s5, %s1198_s17  ;;  %p1204_p2 = scmp.lt.s32.totalorder %s1198_s17, %s1198_s17 }
 0xb86   :  { %p1205_p3 = por %p1204_p2, %p1203_p1 }
 0xb88   :  { %p1206_p4 = pnand %p1205_p3, %p1199_p0 }
 0xc53   :  { %v703_v55 = vpop.f32.mrb[20].mxu1 }
 0xc54   :  { %v710_v56 = vadd.f32 %v703_v55, %v183_v53  ;;  %v705_v57 = vpop.f32.mrb[21].mxu1 }
 0xc55   :  { %v711_v58 = vadd.f32 %v705_v57, %v185_v54  ;;  %v707_v59 = vpop.f32.mrb[22].mxu1 }
 0xc56   :  { %v1033_v60 = vmul.f32 -1.442695, %v710_v56  ;;  %v708_v61 = vpop.f32.mrb[23].mxu1 }
 0xc57   :  { %v1034_v47 = vmul.f32 -1.442695, %v711_v58 }
 0xc58   :  { %1162 = vpow2.f32 %v1033_v60 }
 0xc59   :  { %1164 = vtanh.f32 %v711_v58 }
 0xc62   :  { %v1163_v62 = vpop.eup %1162 }
 0xc63   :  { %v718_v63 = vadd.f32 1.0, %v1163_v62  ;;  %v1165_v0 = vpop.eup %1164 }
 0xc65   :  { %1166 = vrcp.f32 %v718_v63 }
 0xc66   :  { %1168 = vpow2.f32 %v1034_v47 }
 0xc6f   :  { %v1167_v1 = vpop.eup %1166 }
 0xc70   :  { %v726_v2 = vmul.f32 %v1167_v1, %v1165_v0  ;;  %v1169_v48 = vpop.eup %1168  ;;  %v725_v7 = vmul.f32 %v1167_v1, %v657_v41 }
 0xc71   :  { %v719_v3 = vadd.f32 1.0, %v1169_v48 }
 0xc72   :  { %728 = vrot.lane.b32.xlu1 %v726_v2, %s1224_s2 }
 0xc73   :  { %1170 = vrcp.f32 %v719_v3 }
 0xc7d   :  { %v1171_v11 = vpop.eup %1170 }
 0xce4   :  { %v729_v8 = vpop.permute.xlu1 %728 }
 0xce5   :  { %v731_v9 = vadd.f32 %v729_v8, %v725_v7  ;;  %v1045_v8 = vld [vmem:[%s1538_s6] ss:$0 sm:$0xff] }
 0xce7   :  { %1172 = vtanh.f32 %v731_v9 }
 0xcf1   :  { %v1173_v12 = vpop.eup %1172 }
 0xcf2   :  { %v733_v13 = vmul.f32 %v1173_v12, %v1171_v11 }
 0xcf4   :  { %v736_v14 = vpack.c.bf16 %v733_v13, %v733_v13 }
 0xcf6   :  { %738 = vrot.lane.b32.xlu0 %v736_v14, %s1224_s2  ;;  %v1046_v14 = vld [vmem:[#allocation3] ss:$0 sm:$0xff] }
 0xd68   :  { %v739_v15 = vpop.permute.xlu0 %738 }
 0xd69   :  { %1035 = vmatmul.mubr.msk.bf16.vlgmr.msra.gmra.mrb[20].mxu0 %vm291_vm3, %v739_v15 }
 0xd6a   :  { %818 = vmatpush1.bf16.msra.mxu0 %v1313_v31  ;;  %849 = vmatprep.mubr.bf16.mxu0 %v1222_v4  ;;  %v189_v31 = vadd.f32 %v1378_v50, %v1297_v18  ;;  %v1089_v18 = vld [vmem:[%s1536_s4 + $0x8] sm:$0xff]  }
 0xd6b   :  { %819 = vmatprep.subr.bf16.mxu0 %v1318_v32  ;;  %1053 = vmatpush3.bf16.msra.mxu1 %v1089_v18 }
 0xd6e   :  { %820 = vmatpush1.bf16.msra.mxu0 %v1327_v33 }
 0xd6f   :  { %821 = vmatprep.subr.bf16.mxu0 %v1333_v34 }
 0xd72   :  { %822 = vmatpush1.bf16.msra.mxu0 %v1345_v36 }
 0xd73   :  { %823 = vmatprep.subr.bf16.mxu0 %v1351_v38 }
 0xd76   :  { %824 = vmatpush1.bf16.msra.mxu0 %v1361_v39 }
 0xe3c   :  { %v777_v17 = vpop.f32.mrb[20].mxu0 }
 0xe3d   :  { %v784_v4 = vadd.f32 %v777_v17, %v187_v16  ;;  %v779_v19 = vpop.f32.mrb[21].mxu0 }
 0xe3e   :  { %v785_v32 = vadd.f32 %v779_v19, %v189_v31  ;;  %v781_v20 = vpop.f32.mrb[22].mxu0 }
 0xe3f   :  { %v1036_v33 = vmul.f32 -1.442695, %v784_v4  ;;  %v782_v21 = vpop.f32.mrb[23].mxu0 }
 0xe40   :  { %v1037_v49 = vmul.f32 -1.442695, %v785_v32 }
 0xe41   :  { %1174 = vpow2.f32 %v1036_v33 }
 0xe42   :  { %1176 = vtanh.f32 %v785_v32 }
 0xe4b   :  { %v1175_v34 = vpop.eup %1174 }
 0xe4c   :  { %v792_v36 = vadd.f32 1.0, %v1175_v34  ;;  %v1177_v38 = vpop.eup %1176 }
 0xe4e   :  { %1178 = vrcp.f32 %v792_v36 }
 0xe4f   :  { %1180 = vpow2.f32 %v1037_v49 }
 0xe58   :  { %v1179_v39 = vpop.eup %1178 }
 0xe59   :  { %v800_v22 = vmul.f32 %v1179_v39, %v1177_v38  ;;  %v1181_v50 = vpop.eup %1180  ;;  %v799_v23 = vmul.f32 %v1179_v39, %v731_v9 }
 0xe5a   :  { %v793_v26 = vadd.f32 1.0, %v1181_v50 }
 0xe5b   :  { %802 = vrot.lane.b32.xlu1 %v800_v22, %s1224_s2 }
 0xe5c   :  { %1182 = vrcp.f32 %v793_v26 }
 0xe66   :  { %v1183_v28 = vpop.eup %1182 }
 0xecd   :  { %v803_v24 = vpop.permute.xlu1 %802 }
 0xece   :  { %v805_v27 = vadd.f32 %v803_v24, %v799_v23 }
 0xed0   :  { %1184 = vtanh.f32 %v805_v27 }
 0xeda   :  { %v1185_v30 = vpop.eup %1184 }
 0xedb   :  { %v807_v29 = vmul.f32 %v1185_v30, %v1183_v28 }
 0xedd   :  { %v810_v5 = vpack.c.bf16 %v807_v29, %v807_v29 }
 0xedf   :  { %812 = vrot.lane.b32.xlu0 %v810_v5, %s1224_s2 }
 0xf51   :  { %v813_v6 = vpop.permute.xlu0 %812 }
 0xf52   :  { %1038 = vmatmul.mubr.msk.bf16.vlgmr.msra.gmra.mrb[24].mxu0 %vm291_vm3, %v813_v6 }
0x1025   :  { %v851_v40 = vpop.f32.mrb[24].mxu0 }
0x1026   :  { %v858_v41 = vadd.f32 %v851_v40, %v193_v35  ;;  %v853_v42 = vpop.f32.mrb[25].mxu0 }
0x1027   :  { %v859_v43 = vadd.f32 %v853_v42, %v195_v37  ;;  %v855_v44 = vpop.f32.mrb[26].mxu0 }
0x1028   :  { %v1039_v45 = vmul.f32 -1.442695, %v858_v41  ;;  %v856_v46 = vpop.f32.mrb[27].mxu0 }
0x1029   :  { %v1040_v51 = vmul.f32 -1.442695, %v859_v43 }
0x102a   :  { %1186 = vpow2.f32 %v1039_v45 }
0x102b   :  { %1188 = vtanh.f32 %v859_v43 }
0x1034   :  { %v1187_v53 = vpop.eup %1186 }
0x1035   :  { %v866_v54 = vadd.f32 1.0, %v1187_v53  ;;  %v1189_v55 = vpop.eup %1188 }
0x1037   :  { %1190 = vrcp.f32 %v866_v54 }
0x1038   :  { %1192 = vpow2.f32 %v1040_v51 }
0x1041   :  { %v1191_v56 = vpop.eup %1190 }
0x1042   :  { %v874_v57 = vmul.f32 %v1191_v56, %v1189_v55  ;;  %v1193_v52 = vpop.eup %1192  ;;  %v873_v59 = vmul.f32 %v1191_v56, %v805_v27 }
0x1043   :  { %v867_v58 = vadd.f32 1.0, %v1193_v52 }
0x1044   :  { %876 = vrot.lane.b32.xlu1 %v874_v57, %s1224_s2  ;;  %s1226_s2 = smov 32  }
0x1045   :  { %1194 = vrcp.f32 %v867_v58 }
0x104f   :  { %v1195_v62 = vpop.eup %1194 }
0x10b6   :  { %v877_v60 = vpop.permute.xlu1 %876 }
0x10b7   :  { %v879_v61 = vadd.f32 %v877_v60, %v873_v59 }
0x10b9   :  { %1196 = vtanh.f32 %v879_v61 }
0x10c3   :  { %v1197_v63 = vpop.eup %1196 }
0x10c4   :  { %v881_v0 = vmul.f32 %v1197_v63, %v1195_v62 }
0x10c6   :  { %v882_v1 = vpack.c.bf16 %v881_v0, %v881_v0 }
0x10c8   :  { %895 = vrot.lane.b32.xlu0 %v882_v1, %s1226_s2 }
0x113a   :  { %v896_v2 = vpop.permute.xlu0 %895 }
0x113b   :  { %1055 = vmatmul.mubr.msk.bf16.vlgmr.msra.gmra.mrb[24].mxu1 %vm909_vm5, %v896_v2 }
0x120e   :  { %v947_v47 = vpop.f32.mrb[24].mxu1 }
0x120f   :  { %v948_v48 = vadd.f32 %v1041_v25, %v947_v47  ;;  %v1056_v3 = vpop.f32.mrb[25].mxu1 }
0x1210   :  { %v950_v7 = vpop.f32.mrb[26].mxu1 }
0x1211   :  { %v953_v9 = vmax.f32 %v948_v48, 0.0  ;;  %v1057_v11 = vpop.f32.mrb[27].mxu1 }
0x1213   :  { %v961_v12 = vmul.f32 %v1045_v8, %v953_v9 }
0x1215   :  { %v963_v13 = vsel %vm962_vm6, %v961_v12, 0.0 }
0x1216   :  { %964 = vadd.xlane.f32.xlu1 %v963_v13 }
0x12a3   :  { %v965_v15 = vpop.xlane.xlu1 %964 }
0x12a4   :  { %v973_v16 = vadd.f32 %v1046_v14, %v965_v15 }
0x12a6   :  { %976 = vperm.xlu0 %1070, %v973_v16  }
0x1325   :  { %v977_v31 = vpop.permute.xlu0 %976 }
0x1326   :  { %979 = vst [vmem:[#allocation4] sm:$0xff] %v977_v31 }
0x1327   :  { %1209 = shalt.err (!%p1206_p4)
}
0x1328   :  { %s1210_s19 = scalar_lea.hbm %s1540_s8, 128 }
0x1329   :  { %p1211_p5 = scmp.ne.s32.totalorder %s1540_s8, %s1210_s19  ;;  %p1214_p6 = scmp.lt.u32.totalorder %s1210_s19, %s1540_s8 }
0x132b   :  { %p1216_p7 = pnand %p1214_p6, %p1211_p5 }
0x132d   :  { %1219 = shalt.err (!%p1216_p7)
}
0x132e   :  { %989 = dma.vmem_to_hbm [thread:$0]  %s987_s5, 128, %s1540_s8, [#allocation5]  }
0x132f   :  { %1220 = dma.done.wait [#allocation5], 128  }
0x1330   :  { %1221 = vsyncadd [#allocation5], 4294967168 }
0x1331   :  { %993 = vsyncpa [#allocation5], 1 }

</bundles_post_ra>
